<compile_context>
chip_gen: v7x
topology: tpu7x:2x2x1
jax: 0.10.0
libtpu: 0.0.40
codegen_flags: <defaults>
</compile_context>

<pallas_src>
import functools

import jax
import jax.numpy as jnp
from jax.experimental import pallas as pl
from jax.experimental.pallas import tpu as pltpu

NEG_SLOPE = 0.01   # nn.LeakyReLU default negative_slope
LN_EPS = 1e-5      # nn.LayerNorm default eps


def _leaky_relu(x):
    return jnp.where(x > 0, x, NEG_SLOPE * x)


def _mlp_tail_store(h, w2_ref, b2_ref, w3_ref, b3_ref, o_ref, B, S):
    """Shared layers 2..3 + STE; writes the (B, S) mask directly (lane-dense rows)."""
    h = _leaky_relu(
        jnp.dot(h, w2_ref[...], preferred_element_type=jnp.float32) + b2_ref[...])
    w3_row = w3_ref[...]                     # (1, H)
    b3 = b3_ref[...]                         # (1, 1)
    for b in range(B):                       # B is a static Python int (unrolled)
        hb = h[b * S:(b + 1) * S, :]         # (S, H) — aligned sublane slice
        # out_features == 1: (1, H) . (S, H)^T -> (1, S), lane-dense in S (no (N,1) column).
        logit = jax.lax.dot_general(
            w3_row, hb, (((1,), (1,)), ((), ())),
            preferred_element_type=jnp.float32) + b3          # (1, S)
        # StraightThroughEstimator forward: hard threshold at 0.
        o_ref[pl.ds(b, 1), :] = (logit > 0.0).astype(jnp.float32)


# ---------------------------------------------------------------------------
# Fused kernel, feed_encoded_out=False:  STE(MLP(slots))
# ---------------------------------------------------------------------------
def _sparse_mask_kernel(slots_ref, w1_ref, b1_ref, w2_ref, b2_ref, w3_ref, b3_ref,
                        o_ref):
    B, S = o_ref.shape
    h = _leaky_relu(
        jnp.dot(slots_ref[...], w1_ref[...], preferred_element_type=jnp.float32)
        + b1_ref[...])                                         # (B*S, H)
    _mlp_tail_store(h, w2_ref, b2_ref, w3_ref, b3_ref, o_ref, B, S)


# ---------------------------------------------------------------------------
# Fused kernel, feed_encoded_out=True:
#   LayerNorm(inputs) -> linear_map -> (split-w1 "concat") -> MLP -> STE
# ---------------------------------------------------------------------------
def _sparse_mask_encoded_kernel(inp_ref, slots_ref, g_ref, beta_ref, wmap_ref,
                                w1m_ref, w1s_ref, b1_ref, w2_ref, b2_ref,
                                w3_ref, b3_ref, o_ref):
    B, S = o_ref.shape
    I = inp_ref.shape[0] // B

    # LayerNorm over the last (filter) dim, all B*I rows at once.
    x = inp_ref[...]                                           # (B*I, F)
    mean = jnp.mean(x, axis=-1, keepdims=True)
    var = jnp.mean(jnp.square(x - mean), axis=-1, keepdims=True)
    xn = (x - mean) * jax.lax.rsqrt(var + LN_EPS) * g_ref[...] + beta_ref[...]

    # mapped[b] = w_map @ LN(inputs[b])  (== permute -> Linear(in_dim, S, bias=False) -> permute)
    wmap = wmap_ref[...]                                       # (S, I)
    mapped_parts = [
        jnp.dot(wmap, xn[b * I:(b + 1) * I, :], preferred_element_type=jnp.float32)
        for b in range(B)                                      # B static -> unrolled
    ]
    mapped = mapped_parts[0] if B == 1 else jnp.concatenate(mapped_parts, axis=0)  # (B*S, F)

    # First layer without materializing cat([mapped, slots], -1):
    #   cat([mapped, slots]) @ w1  ==  mapped @ w1[:F] + slots @ w1[F:]
    h = _leaky_relu(
        jnp.dot(mapped, w1m_ref[...], preferred_element_type=jnp.float32)
        + jnp.dot(slots_ref[...], w1s_ref[...], preferred_element_type=jnp.float32)
        + b1_ref[...])                                         # (B*S, H)
    _mlp_tail_store(h, w2_ref, b2_ref, w3_ref, b3_ref, o_ref, B, S)


# ---------------------------------------------------------------------------
# Module wrapper (jitted; feed_encoded_out is static)
# ---------------------------------------------------------------------------
def _sparse_mask_fwd(params, slots, inputs=None, *, feed_encoded_out=False, tau=1):
    # tau is accepted but unused, exactly like the PyTorch forward.
    del tau
    B, S, D = slots.shape
    # TODO(synk): torch.squeeze() would also drop B or S if they were 1; we keep (B, S).
    slots2d = slots.reshape(B * S, D).astype(jnp.float32)      # contiguous -> free in XLA

    vmem = pl.BlockSpec(memory_space=pltpu.MemorySpace.VMEM)
    out_shape = jax.ShapeDtypeStruct((B, S), jnp.float32)

    # NOTE: at production scale (large B*S) add a row-tiled grid with a "parallel" axis so
    # v7x's two TensorCores split the rows; at these sizes a single VMEM-resident call wins.
    if feed_encoded_out:
        assert inputs is not None, "feed_encoded_out=True requires `inputs`"
        Bi, I, F = inputs.shape
        assert Bi == B, "inputs and slots batch sizes must match"
        assert F == D, ("feed_encoded_out=True requires filter_dim == slot_size so that "
                        "cat([mapped, slots], -1) matches w1's fan_in")
        inputs2d = inputs.reshape(Bi * I, F).astype(jnp.float32)
        return pl.pallas_call(
            _sparse_mask_encoded_kernel,
            out_shape=out_shape,
            in_specs=[vmem] * 12,
            out_specs=vmem,
        )(inputs2d, slots2d,
          params["ln_gamma"], params["ln_beta"], params["w_map"],
          params["w1_map"], params["w1_slot"], params["b1"],
          params["w2"], params["b2"], params["w3"], params["b3"])
    else:
        return pl.pallas_call(
            _sparse_mask_kernel,
            out_shape=out_shape,
            in_specs=[vmem] * 7,
            out_specs=vmem,
        )(slots2d, params["w1"], params["b1"], params["w2"], params["b2"],
          params["w3"], params["b3"])


sparse_mask_forward = jax.jit(_sparse_mask_fwd,
                              static_argnames=("feed_encoded_out", "tau"))


def init_params(key, in_dim, filter_dim, num_slots, slot_size, hidden_dim,
                feed_encoded_out):
    """Params stored in kernel-ready shapes (no per-call reshapes)."""
    in_features = (2 if feed_encoded_out else 1) * slot_size
    ks = jax.random.split(key, 8)

    def lin_w(k, fan_in, fan_out):
        return jax.random.normal(k, (fan_in, fan_out), jnp.float32) / jnp.sqrt(fan_in)

    w1 = lin_w(ks[0], in_features, hidden_dim)                 # (fan_in, H): kernel does x @ W
    params = {
        "w1": w1,
        "b1": 0.1 * jax.random.normal(ks[1], (1, hidden_dim), jnp.float32),
        "w2": lin_w(ks[2], hidden_dim, hidden_dim),
        "b2": 0.1 * jax.random.normal(ks[3], (1, hidden_dim), jnp.float32),
        "w3": jax.random.normal(ks[4], (1, hidden_dim), jnp.float32)
              / jnp.sqrt(hidden_dim),                          # out_features = 1 (row form)
        "b3": 0.1 * jax.random.normal(ks[5], (1, 1), jnp.float32),
        # feed_encoded_out=True branch
        "ln_gamma": jnp.ones((1, filter_dim), jnp.float32),
        "ln_beta": jnp.zeros((1, filter_dim), jnp.float32),
        "w_map": jax.random.normal(ks[6], (num_slots, in_dim), jnp.float32)
                 / jnp.sqrt(in_dim),                           # torch Linear weight (out, in)
    }
    if feed_encoded_out:
        # Pre-split once: cat([mapped, slots]) @ w1 == mapped @ w1[:F] + slots @ w1[F:].
        params["w1_map"] = w1[:slot_size]
        params["w1_slot"] = w1[slot_size:]
    return params


# ---------------------------------------------------------------------------
# Pure-JAX reference (for verification only)
# ---------------------------------------------------------------------------
def reference_logits(params, slots, inputs, feed_encoded_out):
    if feed_encoded_out:
        x = inputs
        mean = x.mean(-1, keepdims=True)
        var = ((x - mean) ** 2).mean(-1, keepdims=True)
        xn = (x - mean) / jnp.sqrt(var + LN_EPS) * params["ln_gamma"][0] + params["ln_beta"][0]
        xn = jnp.transpose(xn, (0, 2, 1))                      # (B, F, I)
        mapped = xn @ params["w_map"].T                        # (B, F, S)
        mapped = jnp.transpose(mapped, (0, 2, 1))              # (B, S, F)
        in_ = jnp.concatenate([mapped, slots], axis=-1)
    else:
        in_ = slots
    h = _leaky_relu(in_ @ params["w1"] + params["b1"][0])
    h = _leaky_relu(h @ params["w2"] + params["b2"][0])
    logit = h @ params["w3"][0] + params["b3"][0, 0]           # (B, S)
    return logit


def _check(out, params, slots, inputs, feed_encoded_out):
    logit = reference_logits(params, slots, inputs, feed_encoded_out)
    ref_mask = (logit > 0).astype(jnp.float32)
    # Only enforce agreement away from the decision boundary (MXU vs XLA rounding).
    mismatch = (out != ref_mask) & (jnp.abs(logit) > 1e-3)
    assert not bool(jnp.any(mismatch)), "kernel output disagrees with reference"


if __name__ == "__main__":
    B, S, D = 2, 8, 32           # batch, num_slots, slot_size
    in_dim, filter_dim = 64, 32  # filter_dim must equal slot_size for the concat branch
    hidden_dim = 128

    key = jax.random.PRNGKey(0)
    k_slots, k_inputs, k_p0, k_p1 = jax.random.split(key, 4)
    slots = jax.random.normal(k_slots, (B, S, D), jnp.float32)
    inputs = jax.random.normal(k_inputs, (B, in_dim, filter_dim), jnp.float32)

    # Default config: feed_encoded_out=False
    p0 = init_params(k_p0, in_dim, filter_dim, S, D, hidden_dim, feed_encoded_out=False)
    out0 = sparse_mask_forward(p0, slots, feed_encoded_out=False)
    jax.block_until_ready(out0)
    assert out0.shape == (B, S) and out0.dtype == jnp.float32
    _check(out0, p0, slots, None, False)

    # feed_encoded_out=True config (LayerNorm + linear_map + split-w1 "concat" path)
    p1 = init_params(k_p1, in_dim, filter_dim, S, D, hidden_dim, feed_encoded_out=True)
    out1 = sparse_mask_forward(p1, slots, inputs=inputs, feed_encoded_out=True)
    jax.block_until_ready(out1)
    assert out1.shape == (B, S) and out1.dtype == jnp.float32
    _check(out1, p1, slots, inputs, True)

    print("KERNEL_OK")
</pallas_src>

<mosaic_0001>
module attributes {stable_mosaic.version = 11 : i64} {
  func.func @_sparse_mask_kernel(%arg0: memref<16x32xf32, #tpu.memory_space<vmem>>, %arg1: memref<32x128xf32, #tpu.memory_space<vmem>>, %arg2: memref<1x128xf32, #tpu.memory_space<vmem>>, %arg3: memref<128x128xf32, #tpu.memory_space<vmem>>, %arg4: memref<1x128xf32, #tpu.memory_space<vmem>>, %arg5: memref<1x128xf32, #tpu.memory_space<vmem>>, %arg6: memref<1x1xf32, #tpu.memory_space<vmem>>, %arg7: memref<2x8xf32, #tpu.memory_space<vmem>>) attributes {dimension_semantics = [], scalar_prefetch = 0 : i64, scratch_operands = 0 : i64, tpu.core_type = #tpu.core_type<tc>} {
    %c0 = arith.constant 0 : index
    %c0_0 = arith.constant 0 : index
    %0 = vector.load %arg0[%c0, %c0_0] : memref<16x32xf32, #tpu.memory_space<vmem>>, vector<16x32xf32>
    %c0_1 = arith.constant 0 : index
    %c0_2 = arith.constant 0 : index
    %1 = vector.load %arg1[%c0_1, %c0_2] : memref<32x128xf32, #tpu.memory_space<vmem>>, vector<32x128xf32>
    %cst = arith.constant dense<0.000000e+00> : vector<16x128xf32>
    %2 = tpu.matmul %0, %1, %cst {dimension_numbers = #tpu.dot_dimension_numbers<[1], [0], [0], [1], [0, 0, 1, 1], [], []>} : vector<16x32xf32>, vector<32x128xf32>, vector<16x128xf32> -> vector<16x128xf32>
    %c0_3 = arith.constant 0 : index
    %c0_4 = arith.constant 0 : index
    %3 = vector.load %arg2[%c0_3, %c0_4] : memref<1x128xf32, #tpu.memory_space<vmem>>, vector<1x128xf32>
    %4 = vector.broadcast %3 : vector<1x128xf32> to vector<16x128xf32>
    %5 = arith.addf %2, %4 : vector<16x128xf32>
    %cst_5 = arith.constant 0.000000e+00 : f32
    %6 = vector.broadcast %cst_5 : f32 to vector<16x128xf32>
    %7 = arith.cmpf ogt, %5, %6 : vector<16x128xf32>
    %cst_6 = arith.constant 0.00999999977 : f32
    %8 = vector.broadcast %cst_6 : f32 to vector<16x128xf32>
    %9 = arith.mulf %8, %5 : vector<16x128xf32>
    %10 = arith.select %7, %5, %9 : vector<16x128xi1>, vector<16x128xf32>
    %c0_7 = arith.constant 0 : index
    %c0_8 = arith.constant 0 : index
    %11 = vector.load %arg3[%c0_7, %c0_8] : memref<128x128xf32, #tpu.memory_space<vmem>>, vector<128x128xf32>
    %cst_9 = arith.constant dense<0.000000e+00> : vector<16x128xf32>
    %12 = tpu.matmul %10, %11, %cst_9 {dimension_numbers = #tpu.dot_dimension_numbers<[1], [0], [0], [1], [0, 0, 1, 1], [], []>} : vector<16x128xf32>, vector<128x128xf32>, vector<16x128xf32> -> vector<16x128xf32>
    %c0_10 = arith.constant 0 : index
    %c0_11 = arith.constant 0 : index
    %13 = vector.load %arg4[%c0_10, %c0_11] : memref<1x128xf32, #tpu.memory_space<vmem>>, vector<1x128xf32>
    %14 = vector.broadcast %13 : vector<1x128xf32> to vector<16x128xf32>
    %15 = arith.addf %12, %14 : vector<16x128xf32>
    %cst_12 = arith.constant 0.000000e+00 : f32
    %16 = vector.broadcast %cst_12 : f32 to vector<16x128xf32>
    %17 = arith.cmpf ogt, %15, %16 : vector<16x128xf32>
    %cst_13 = arith.constant 0.00999999977 : f32
    %18 = vector.broadcast %cst_13 : f32 to vector<16x128xf32>
    %19 = arith.mulf %18, %15 : vector<16x128xf32>
    %20 = arith.select %17, %15, %19 : vector<16x128xi1>, vector<16x128xf32>
    %c0_14 = arith.constant 0 : index
    %c0_15 = arith.constant 0 : index
    %21 = vector.load %arg5[%c0_14, %c0_15] : memref<1x128xf32, #tpu.memory_space<vmem>>, vector<1x128xf32>
    %c0_16 = arith.constant 0 : index
    %c0_17 = arith.constant 0 : index
    %22 = vector.load %arg6[%c0_16, %c0_17] : memref<1x1xf32, #tpu.memory_space<vmem>>, vector<1x1xf32>
    %23 = vector.extract_strided_slice %20 {offsets = [0, 0], sizes = [8, 128], strides = [1, 1]} : vector<16x128xf32> to vector<8x128xf32>
    %cst_18 = arith.constant dense<0.000000e+00> : vector<1x8xf32>
    %24 = tpu.matmul %21, %23, %cst_18 {dimension_numbers = #tpu.dot_dimension_numbers<[1], [1], [0], [0], [0, 0, 1, 0], [], []>} : vector<1x128xf32>, vector<8x128xf32>, vector<1x8xf32> -> vector<1x8xf32>
    %25 = vector.broadcast %22 : vector<1x1xf32> to vector<1x8xf32>
    %26 = arith.addf %24, %25 : vector<1x8xf32>
    %cst_19 = arith.constant 0.000000e+00 : f32
    %27 = vector.broadcast %cst_19 : f32 to vector<1x8xf32>
    %28 = arith.cmpf ogt, %26, %27 : vector<1x8xf32>
    %29 = arith.extui %28 : vector<1x8xi1> to vector<1x8xi32>
    %30 = arith.sitofp %29 : vector<1x8xi32> to vector<1x8xf32>
    %c0_20 = arith.constant 0 : index
    %c0_21 = arith.constant 0 : index
    %31 = vector.load %arg7[%c0_20, %c0_21] : memref<2x8xf32, #tpu.memory_space<vmem>>, vector<1x8xf32>
    tpu.vector_store %arg7[%c0_20, %c0_21], %30 {strides = array<i32>} : memref<2x8xf32, #tpu.memory_space<vmem>>, vector<1x8xf32>,
    %32 = vector.extract_strided_slice %20 {offsets = [8, 0], sizes = [8, 128], strides = [1, 1]} : vector<16x128xf32> to vector<8x128xf32>
    %cst_22 = arith.constant dense<0.000000e+00> : vector<1x8xf32>
    %33 = tpu.matmul %21, %32, %cst_22 {dimension_numbers = #tpu.dot_dimension_numbers<[1], [1], [0], [0], [0, 0, 1, 0], [], []>} : vector<1x128xf32>, vector<8x128xf32>, vector<1x8xf32> -> vector<1x8xf32>
    %34 = vector.broadcast %22 : vector<1x1xf32> to vector<1x8xf32>
    %35 = arith.addf %33, %34 : vector<1x8xf32>
    %cst_23 = arith.constant 0.000000e+00 : f32
    %36 = vector.broadcast %cst_23 : f32 to vector<1x8xf32>
    %37 = arith.cmpf ogt, %35, %36 : vector<1x8xf32>
    %38 = arith.extui %37 : vector<1x8xi1> to vector<1x8xi32>
    %39 = arith.sitofp %38 : vector<1x8xi32> to vector<1x8xf32>
    %c1 = arith.constant 1 : index
    %c0_24 = arith.constant 0 : index
    %40 = vector.load %arg7[%c1, %c0_24] : memref<2x8xf32, #tpu.memory_space<vmem>>, vector<1x8xf32>
    tpu.vector_store %arg7[%c1, %c0_24], %39 {strides = array<i32>} : memref<2x8xf32, #tpu.memory_space<vmem>>, vector<1x8xf32>,
    return
  }
}

</mosaic_0001>

<bundles_post_ra>
// kernel: _sparse_mask_fwd.1
= control target key start
LH: loop header
LB: loop body
LE: loop exit
PB: predicated region body
PF: predicated region fallthrough
CT: control target
= control target key end

     0   :  { %s755_s0 = inlined_call_operand.vmem [shape: f32[16,32], index: 0, kind: input, shape index: {}]   ;;  %s756_s1 = inlined_call_operand.hbm [shape: f32[32,128], index: 1, kind: input, shape index: {}]   ;;  %s757_s2 = inlined_call_operand.vmem [shape: f32[1,128], index: 2, kind: input, shape index: {}]   ;;  %s758_s3 = inlined_call_operand.hbm [shape: f32[128,128], index: 3, kind: input, shape index: {}]   ;;  %s759_s4 = inlined_call_operand.vmem [shape: f32[1,128], index: 4, kind: input, shape index: {}]   ;;  %s760_s5 = inlined_call_operand.vmem [shape: f32[1,128], index: 5, kind: input, shape index: {}]   ;;  %s761_s6 = inlined_call_operand.<no memory space> [shape: f32[1,1], index: 6, kind: input, shape index: {}]   ;;  %s762_s7 = inlined_call_operand.hbm [shape: f32[2,8], index: 7, kind: output, shape index: {}]  }
   0x1   :  { %v12_v0 = vstv %s761_s6 }
   0x2   :  { %13 = vst [vmem:[#allocation2] sm:$0x1] %v12_v0 }
   0x3   :  { %14 = vsyncpa [#allocation4], 0 }
   0x4   :  { %15 = vsyncpa [#allocation7], 0 }
   0x5   :  { %16 = vsyncpa [#allocation5], 0  ;;  %s649_s26 = smov [#allocation3]   ;;  %s577_s30 = scalar_lea.hbm %s756_s1, 512 }
   0x6   :  { %s24_s27 = sshll.u32 %s649_s26, 4  ;;  %p578_p0 = scmp.ne.s32.totalorder %s756_s1, %s577_s30  ;;  %s25_s27 = int_to_ptr.vmem [resolvable:$true] %s24_s27 }
   0x7   :  { %p581_p1 = scmp.lt.u32.totalorder %s577_s30, %s756_s1 }
   0x9   :  { %p583_p2 = pnand %p581_p1, %p578_p0 }
   0xb   :  { %586 = shalt.err (!%p583_p2)
}
   0xc   :  { %s587_s6 = scalar_lea.vmem %s25_s27, 512  ;;  %p592_p4 = scmp.lt.s32.totalorder %s25_s27, %s25_s27 }
   0xd   :  { %p588_p3 = scmp.ne.s32.totalorder %s25_s27, %s587_s6  ;;  %p593_p5 = scmp.lt.s32.totalorder %s587_s6, %s587_s6 }
   0xf   :  { %p594_p6 = por %p593_p5, %p592_p4 }
  0x11   :  { %p595_p7 = pnand %p594_p6, %p588_p3 }
  0x13   :  { %598 = shalt.err (!%p595_p7)
}
  0x14   :  { %s650_s12 = smov 128   ;;  %s651_s13 = smov 8  }
  0x15   :  { %30 = dma.hbm_to_vmem [thread:$0]  %s756_s1, 512, %s25_s27, [#allocation4], %s650_s12, %s650_s12, %s651_s13  }
  0x16   :  { %s652_s16 = smov [#allocation6]   ;;  %s599_s20 = scalar_lea.hbm %s758_s3, 2048 }
  0x17   :  { %s38_s17 = sshll.u32 %s652_s16, 4  ;;  %p600_p8 = scmp.ne.s32.totalorder %s758_s3, %s599_s20  ;;  %s39_s17 = int_to_ptr.vmem [resolvable:$true] %s38_s17 }
  0x18   :  { %p603_p9 = scmp.lt.u32.totalorder %s599_s20, %s758_s3 }
  0x1a   :  { %p605_p10 = pnand %p603_p9, %p600_p8 }
  0x1c   :  { %608 = shalt.err (!%p605_p10)
}
  0x1d   :  { %s609_s25 = scalar_lea.vmem %s39_s17, 2048  ;;  %p614_p12 = scmp.lt.s32.totalorder %s39_s17, %s39_s17 }
  0x1e   :  { %p610_p11 = scmp.ne.s32.totalorder %s39_s17, %s609_s25  ;;  %p615_p13 = scmp.lt.s32.totalorder %s609_s25, %s609_s25 }
  0x20   :  { %p616_p0 = por %p615_p13, %p614_p12 }
  0x22   :  { %p617_p1 = pnand %p616_p0, %p610_p11 }
  0x24   :  { %620 = shalt.err (!%p617_p1)
}
  0x25   :  { %44 = dma.hbm_to_vmem [thread:$0]  %s758_s3, 2048, %s39_s17, [#allocation7], %s650_s12, %s650_s12, %s651_s13  }
  0x26   :  { %643 = dma.done.wait [#allocation4], 512  }
  0x27   :  { %644 = vsyncadd [#allocation4], 4294966784 }
  0x28   :  { %645 = dma.done.wait [#allocation7], 2048  }
  0x29   :  { %646 = vsyncadd [#allocation7], 4294965248  ;;  %vm70_vm0 = vcmask 261120   ;;  %v59_v1 = vld [vmem:[#allocation3] sm:$0xff]  ;;  %v60_v2 = vld [vmem:[#allocation3 + $0x8] sm:$0xff]  ;;  %v653_v42 = vmov 0.0   ;;  %v269_v55 = vlaneseq }
  0x2a   :  { %v61_v3 = vld [vmem:[#allocation3 + $0x10] sm:$0xff]  ;;  %v528_v4 = vpack.c.bf16 %v60_v2, %v59_v1  ;;  %v62_v5 = vld [vmem:[#allocation3 + $0x18] sm:$0xff]  ;;  %v158_v8 = vld [vmem:[#allocation6] sm:$0xff]  ;;  %vm654_vm3 = vmmov 0   ;;  %v655_v44 = vmov 0   ;;  %vm346_vm6 = vcmask 57344  }
  0x2b   :  { %v57_v6 = vld [vmem:[%s755_s0] sm:$0xff]  ;;  %v532_v7 = vpack.c.bf16 %v62_v5, %v61_v3  ;;  %v159_v9 = vld [vmem:[#allocation6 + $0x8] sm:$0xff]  ;;  %v160_v10 = vld [vmem:[#allocation6 + $0x10] sm:$0xff]  ;;  %576 = vset.pattern.permute.xlu0 %v655_v44  ;;  %v270_v56 = vshrl.u32 %v269_v55, 7 }
  0x2c   :  { %480 = vmatprep.mubr.msk.f32.mxu0 %vm70_vm0, %v57_v6  ;;  %529 = vmatprep.subr.bf16.mxu0 %v528_v4  ;;  %v536_v11 = vpack.c.bf16 %v159_v9, %v158_v8  ;;  %v161_v12 = vld [vmem:[#allocation6 + $0x18] sm:$0xff]  ;;  %v162_v14 = vld [vmem:[#allocation6 + $0x20] sm:$0xff]  ;;  %v163_v15 = vld [vmem:[#allocation6 + $0x28] sm:$0xff] }
  0x2d   :  { %531 = vmatpush3.bf16.msra.mxu0 %v528_v4  ;;  %v540_v13 = vpack.c.bf16 %v161_v12, %v160_v10  ;;  %v544_v16 = vpack.c.bf16 %v163_v15, %v162_v14  ;;  %v58_v17 = vld [vmem:[%s755_s0 + $0x8] sm:$0xff]  ;;  %v164_v18 = vld [vmem:[#allocation6 + $0x30] sm:$0xff]  ;;  %v165_v19 = vld [vmem:[#allocation6 + $0x38] sm:$0xff]  ;;  %v271_v57 = vsub.s32 0, %v270_v56 }
  0x2e   :  { %533 = vmatprep.subr.bf16.mxu0 %v532_v7  ;;  %537 = vmatprep.subr.bf16.mxu1 %v536_v11  ;;  %v548_v20 = vpack.c.bf16 %v165_v19, %v164_v18  ;;  %v166_v21 = vld [vmem:[#allocation6 + $0x40] sm:$0xff]  ;;  %v167_v22 = vld [vmem:[#allocation6 + $0x48] sm:$0xff]  ;;  %v168_v24 = vld [vmem:[#allocation6 + $0x50] sm:$0xff] }
  0x2f   :  { %539 = vmatpush3.bf16.msra.mxu1 %v536_v11  ;;  %v552_v23 = vpack.c.bf16 %v167_v22, %v166_v21  ;;  %v169_v25 = vld [vmem:[#allocation6 + $0x58] sm:$0xff]  ;;  %v170_v27 = vld [vmem:[#allocation6 + $0x60] sm:$0xff]  ;;  %v171_v28 = vld [vmem:[#allocation6 + $0x68] sm:$0xff] }
  0x30   :  { %541 = vmatprep.subr.bf16.mxu1 %v540_v13  ;;  %v556_v26 = vpack.c.bf16 %v169_v25, %v168_v24  ;;  %v560_v29 = vpack.c.bf16 %v171_v28, %v170_v27  ;;  %v172_v30 = vld [vmem:[#allocation6 + $0x70] sm:$0xff]  ;;  %v173_v31 = vld [vmem:[#allocation6 + $0x78] sm:$0xff] }
  0x31   :  { %535 = vmatpush3.bf16.msra.mxu0 %v532_v7  ;;  %v564_v32 = vpack.c.bf16 %v173_v31, %v172_v30  ;;  %v438_v33 = vld [vmem:[%s757_s2] ss:$0 sm:$0xff] }
  0x32   :  { %518 = vmatprep.subr.mxu0 %v653_v42  ;;  %v263_v43 = vld [vmem:[#allocation2] sm:$0x1] }
  0x33   :  { %543 = vmatpush3.bf16.msra.mxu1 %v540_v13  ;;  %266 = vperm.xlu0 %576, %v263_v43   ;;  %v441_v45 = vld [vmem:[%s759_s4] ss:$0 sm:$0xff]  ;;  %s656_s4 = smov [#allocation8]  }
  0x34   :  { %481 = vmatmul.mubr.msk.f32.vlgmr.msra.gmra.mrb[0].mxu0 %vm70_vm0, %v58_v17  ;;  %545 = vmatprep.subr.bf16.mxu1 %v544_v16  ;;  %v262_v53 = vld [vmem:[%s760_s5] sm:$0x1]  ;;  %s428_s5 = sshll.u32 %s656_s4, 4  ;;  %s429_s5 = int_to_ptr.vmem [resolvable:$true] %s428_s5 }
  0x35   :  { %520 = vmatprep.mubr.msk.f32.mxu0 %vm654_vm3, %v653_v42  ;;  %s621_s11 = scalar_lea.vmem %s429_s5, 32  ;;  %p626_p3 = scmp.lt.s32.totalorder %s429_s5, %s429_s5 }
  0x36   :  { %p622_p2 = scmp.ne.s32.totalorder %s429_s5, %s621_s11  ;;  %p627_p4 = scmp.lt.s32.totalorder %s621_s11, %s621_s11 }
  0x37   :  { %547 = vmatpush3.bf16.msra.mxu1 %v544_v16 }
  0x38   :  { %549 = vmatprep.subr.bf16.mxu1 %v548_v20  ;;  %p628_p5 = por %p627_p4, %p626_p3 }
  0x3a   :  { %p629_p6 = pnand %p628_p5, %p622_p2 }
  0x3b   :  { %551 = vmatpush3.bf16.msra.mxu1 %v548_v20 }
  0x3c   :  { %553 = vmatprep.subr.bf16.mxu1 %v552_v23 }
  0x3f   :  { %555 = vmatpush3.bf16.msra.mxu1 %v552_v23 }
  0x40   :  { %557 = vmatprep.subr.bf16.mxu1 %v556_v26 }
  0x43   :  { %559 = vmatpush3.bf16.msra.mxu1 %v556_v26 }
  0x44   :  { %561 = vmatprep.subr.bf16.mxu1 %v560_v29 }
  0x47   :  { %563 = vmatpush3.bf16.msra.mxu1 %v560_v29 }
  0x48   :  { %565 = vmatprep.subr.bf16.mxu1 %v564_v32 }
  0x4b   :  { %567 = vmatpush3.bf16.msra.mxu1 %v564_v32 }
  0xb2   :  { %v267_v58 = vpop.permute.xlu0 %266 }
  0xb3   :  { %v272_v59 = vrot.slane %v267_v58, %v271_v57 }
 0x107   :  { %v482_v34 = vpop.f32.mrb[0].mxu0 }
 0x108   :  { %v149_v35 = vadd.f32 %v482_v34, %v438_v33  ;;  %v143_v36 = vpop.f32.mrb[1].mxu0 }
 0x109   :  { %v144_v37 = vadd.f32 %v438_v33, %v143_v36 }
 0x10a   :  { %v155_v38 = vmul.f32 0.01, %v149_v35  ;;  %vm153_vm2 = vcmp.gt.f32.partialorder %v149_v35, 0.0 }
 0x10b   :  { %vm152_vm1 = vcmp.gt.f32.partialorder %v144_v37, 0.0  ;;  %v154_v39 = vmul.f32 0.01, %v144_v37 }
 0x10c   :  { %v157_v41 = vsel %vm153_vm2, %v149_v35, %v155_v38 }
 0x10d   :  { %v156_v40 = vsel %vm152_vm1, %v144_v37, %v154_v39 }
 0x10e   :  { %515 = vmatprep.mubr.f32.mxu1 %v156_v40 }
 0x10f   :  { %516 = vmatmul.mubr.f32.vlgmr.msra.gmra.mrb[0].mxu1 %v157_v41 }
 0x1e2   :  { %v517_v46 = vpop.f32.mrb[0].mxu1 }
 0x1e3   :  { %v247_v47 = vpop.f32.mrb[1].mxu1  ;;  %v253_v48 = vadd.f32 %v517_v46, %v441_v45 }
 0x1e4   :  { %v248_v49 = vadd.f32 %v441_v45, %v247_v47 }
 0x1e5   :  { %v259_v51 = vmul.f32 0.01, %v253_v48  ;;  %vm257_vm5 = vcmp.gt.f32.partialorder %v253_v48, 0.0 }
 0x1e6   :  { %vm256_vm4 = vcmp.gt.f32.partialorder %v248_v49, 0.0  ;;  %v258_v50 = vmul.f32 0.01, %v248_v49 }
 0x1e7   :  { %v261_v54 = vsel %vm257_vm5, %v253_v48, %v259_v51 }
 0x1e8   :  { %v260_v52 = vsel %vm256_vm4, %v248_v49, %v258_v50 }
 0x1e9   :  { %519 = vmatpush3.xpose.msra.mxu0 %v260_v52 }
 0x1ea   :  { %523 = vmatprep.subr.mxu0 %v653_v42 }
 0x1ec   :  { %521 = vmatmul.mubr.f32.vlgmr.msra.gmra.mrb[2].mxu0 %v262_v53 }
 0x1ed   :  { %524 = vmatpush3.xpose.msra.mxu0 %v261_v54  ;;  %525 = vmatprep.mubr.msk.f32.mxu0 %vm654_vm3, %v653_v42 }
 0x1f0   :  { %526 = vmatmul.mubr.f32.vlgmr.msra.gmra.mrb[4].mxu0 %v262_v53 }
 0x2bf   :  { %v339_v60 = vpop.f32.mrb[2].mxu0 }
 0x2c0   :  { %v340_v61 = vadd.f32 %v339_v60, %v272_v59  ;;  %v522_v62 = vpop.f32.mrb[3].mxu0 }
 0x2c2   :  { %vm343_vm7 = vcmp.gt.f32.partialorder %v340_v61, 0.0 }
 0x2c3   :  { %v442_v63 = vsel %vm343_vm7, 1.0, %v653_v42  ;;  %v414_v0 = vpop.f32.mrb[4].mxu0 }
 0x2c4   :  { %v415_v1 = vadd.f32 %v414_v0, %v272_v59  ;;  %v527_v2 = vpop.f32.mrb[5].mxu0  ;;  %347 = vst.msk [vmem:[#allocation8] sm:$0x1] %vm346_vm6, %v442_v63 }
 0x2c6   :  { %vm418_vm8 = vcmp.gt.f32.partialorder %v415_v1, 0.0 }
 0x2c7   :  { %v443_v3 = vsel %vm418_vm8, 1.0, %v653_v42 }
 0x2c8   :  { %421 = vst.msk [vmem:[#allocation8 + $0x1] sm:$0x1] %vm346_vm6, %v443_v3 }
 0x2c9   :  { %632 = shalt.err (!%p629_p6)
}
 0x2ca   :  { %s633_s13 = scalar_lea.hbm %s762_s7, 32 }
 0x2cb   :  { %p634_p7 = scmp.ne.s32.totalorder %s762_s7, %s633_s13  ;;  %p637_p8 = scmp.lt.u32.totalorder %s633_s13, %s762_s7 }
 0x2cd   :  { %p639_p9 = pnand %p637_p8, %p634_p7 }
 0x2cf   :  { %642 = shalt.err (!%p639_p9)
}
 0x2d0   :  { %431 = dma.vmem_to_hbm [thread:$0]  %s429_s5, 32, %s762_s7, [#allocation5]  }
 0x2d1   :  { %647 = dma.done.wait [#allocation5], 32  }
 0x2d2   :  { %648 = vsyncadd [#allocation5], 4294967264 }
 0x2d3   :  { %435 = vsyncpa [#allocation4], 1 }
 0x2d4   :  { %436 = vsyncpa [#allocation7], 1 }
 0x2d5   :  { %437 = vsyncpa [#allocation5], 1 }

</bundles_post_ra>
